<compile_context>
chip_gen: v5e
topology: v5e:2x2
jax: 0.10.0
libtpu: 0.0.40
codegen_flags: <defaults>
</compile_context>

<pallas_src>
import functools
import math

import jax
import jax.numpy as jnp
from jax.experimental import pallas as pl
from jax.experimental.pallas import tpu as pltpu

LANES = 128            # lane width (last dim of every block)
SUBLANES = 8           # f32 sublanes per vreg
ROW_ALIGN = 32         # row granularity safe for f32 / bf16 / int8 / fp8 packing
MAX_BLOCK_ROWS = 4096  # 4096 x 128 x 4B = 2 MiB f32 per input per buffer


def _bce_blur_kernel(pred_ref, true_ref, out_ref, *, inv_alpha, factor_const,
                     block_rows, last_valid_rows):
    """One grid step: BCE-with-logits * blur factor on a (block_rows, 128)
    tile, reduced to an (8, 128) vreg-shaped partial sum."""
    x = pred_ref[...].astype(jnp.float32)   # logits
    y = true_ref[...].astype(jnp.float32)   # targets

    # Numerically-stable BCEWithLogits (reduction='none'):
    #   max(x, 0) - x*y + log(1 + exp(-|x|))
    e = jnp.exp(-jnp.abs(x))                          # reused for sigmoid below
    bce = jnp.maximum(x, 0.0) - x * y + jnp.log1p(e)

    # sigmoid(x) from the already-computed e (saves one exp per element):
    #   x >= 0: 1 / (1 + e)   (e = exp(-x));   x < 0: e / (1 + e)   (e = exp(x))
    r = 1.0 / (1.0 + e)      # exact divide on purpose (see header note)
    p = jnp.where(x >= 0.0, r, e * r)

    # 1 - exp((dx - 1) * inv_alpha) == 1 - exp(-inv_alpha) * exp(dx * inv_alpha)
    alpha_factor = 1.0 - factor_const * jnp.exp((p - y) * inv_alpha)
    loss = bce * alpha_factor

    def partial_sum(v):
        # (block_rows, 128) -> (block_rows//8, 8, 128) -> sum over tile groups:
        # vreg-aligned VPU adds only, no cross-lane/sublane movement.
        return v.reshape(block_rows // SUBLANES, SUBLANES, LANES).sum(axis=0)

    if last_valid_rows == block_rows:
        # Every block (including the last) is fully valid: no masking at all.
        out_ref[0] = partial_sum(loss)
    else:
        is_last = pl.program_id(0) == pl.num_programs(0) - 1

        @pl.when(jnp.logical_not(is_last))
        def _():
            out_ref[0] = partial_sum(loss)

        @pl.when(is_last)
        def _():
            # Only the last block can contain out-of-bounds (stale VMEM) rows.
            # Row-level compare + SELECT (not multiply) so NaN garbage cannot
            # propagate into the partial sum.
            row = jax.lax.broadcasted_iota(jnp.int32, loss.shape, 0)
            out_ref[0] = partial_sum(jnp.where(row < last_valid_rows, loss, 0.0))


def _loss_elems_jnp(x, y, inv_alpha, factor_const):
    """Plain-jnp per-element loss (used only for the tiny unaligned tail)."""
    x = x.astype(jnp.float32)
    y = y.astype(jnp.float32)
    e = jnp.exp(-jnp.abs(x))
    bce = jnp.maximum(x, 0.0) - x * y + jnp.log1p(e)
    r = 1.0 / (1.0 + e)
    p = jnp.where(x >= 0.0, r, e * r)
    return bce * (1.0 - factor_const * jnp.exp((p - y) * inv_alpha))


def bce_blur_with_logits_loss(pred, true, alpha=0.05):
    """JAX wrapper. pred, true: same shape (any rank/dtype). Returns f32 scalar."""
    assert pred.shape == true.shape
    n_elems = pred.size
    inv_alpha = 1.0 / (float(alpha) + 1e-4)
    factor_const = math.exp(-inv_alpha)   # hoisted exp(-1/(alpha+1e-4))

    pred_f = pred.reshape(-1)
    true_f = true.reshape(-1)

    rows = n_elems // LANES                       # full 128-lane rows
    rows_main = (rows // SUBLANES) * SUBLANES     # 8-row aligned prefix for the kernel
    n_main = rows_main * LANES

    # Tail (< 8*128 + 128 elements): computed with plain jnp — negligible work,
    # and it removes the old full-array jnp.pad HBM round trip.
    if n_main < n_elems:
        tail_sum = jnp.sum(_loss_elems_jnp(pred_f[n_main:], true_f[n_main:],
                                           inv_alpha, factor_const))
    else:
        tail_sum = jnp.float32(0.0)

    if rows_main == 0:
        # Entire input is smaller than one 8x128 tile: pure jnp path.
        return tail_sum / jnp.float32(n_elems)

    # Aligned case is a zero-copy bitcast reshape; ragged case does a single
    # prefix slice (still cheaper than the old pad of the full array).
    if n_main == n_elems:
        pred2d = pred_f.reshape(rows_main, LANES)
        true2d = true_f.reshape(rows_main, LANES)
    else:
        pred2d = pred_f[:n_main].reshape(rows_main, LANES)
        true2d = true_f[:n_main].reshape(rows_main, LANES)

    # Block-row choice:
    #   * tiny slab  -> single full-extent block (always layout-legal),
    #   * otherwise  -> >= 2 blocks (v7x dual-TC sharding of the parallel axis),
    #                   32-row aligned (packed-dtype safe), capped at 2 MiB f32.
    if rows_main < 2 * ROW_ALIGN:
        block_rows = rows_main
    else:
        block_rows = min(MAX_BLOCK_ROWS,
                         pl.cdiv(rows_main, 2 * ROW_ALIGN) * ROW_ALIGN)
    n_blocks = pl.cdiv(rows_main, block_rows)
    last_valid_rows = rows_main - (n_blocks - 1) * block_rows

    kernel = functools.partial(
        _bce_blur_kernel,
        inv_alpha=inv_alpha,
        factor_const=factor_const,
        block_rows=int(block_rows),
        last_valid_rows=int(last_valid_rows),
    )

    partials = pl.pallas_call(
        kernel,
        out_shape=jax.ShapeDtypeStruct((n_blocks, SUBLANES, LANES), jnp.float32),
        grid_spec=pltpu.PrefetchScalarGridSpec(
            num_scalar_prefetch=0,
            grid=(n_blocks,),
            in_specs=[
                pl.BlockSpec((block_rows, LANES), lambda i: (i, 0)),
                pl.BlockSpec((block_rows, LANES), lambda i: (i, 0)),
            ],
            out_specs=pl.BlockSpec((1, SUBLANES, LANES), lambda i: (i, 0, 0)),
        ),
        compiler_params=pltpu.CompilerParams(
            # Each grid step owns a distinct output block -> fully parallel
            # (lets v7x shard the axis across both TensorCores).
            dimension_semantics=("parallel",),
            # 2 inputs x 2 buffers x 2 MiB = 8 MiB; state the limit explicitly.
            vmem_limit_bytes=32 * 1024 * 1024,
        ),
    )(pred2d, true2d)

    # Final tiny reduction of the per-block partials + tail + mean.
    return (jnp.sum(partials) + tail_sum) / jnp.float32(n_elems)


def _reference(pred, true, alpha=0.05):
    """Pure-JAX reference mirroring the PyTorch module."""
    x = pred.astype(jnp.float32)
    y = true.astype(jnp.float32)
    loss = jnp.maximum(x, 0.0) - x * y + jnp.log1p(jnp.exp(-jnp.abs(x)))
    p = jax.nn.sigmoid(x)
    dx = p - y
    alpha_factor = 1.0 - jnp.exp((dx - 1.0) / (alpha + 0.0001))
    return jnp.mean(loss * alpha_factor)


if __name__ == "__main__":
    key = jax.random.PRNGKey(0)
    k1, k2, k3, k4 = jax.random.split(key, 4)

    # Main check: NCHW-shaped logits/targets like a small detection head.
    shape = (2, 4, 16, 16)
    pred = jax.random.normal(k1, shape, dtype=jnp.float32)
    true = (jax.random.uniform(k2, shape) > 0.5).astype(jnp.float32)

    out = jax.block_until_ready(bce_blur_with_logits_loss(pred, true, alpha=0.05))
    ref = _reference(pred, true, alpha=0.05)
    assert jnp.allclose(out, ref, atol=1e-5, rtol=1e-5), (out, ref)

    # Ragged shape: exercises the jnp tail path + aligned-prefix slab.
    shape2 = (3, 5, 7, 11)
    pred2 = jax.random.normal(k3, shape2, dtype=jnp.float32)
    true2 = (jax.random.uniform(k4, shape2) > 0.5).astype(jnp.float32)
    out2 = jax.block_until_ready(bce_blur_with_logits_loss(pred2, true2, alpha=0.05))
    ref2 = _reference(pred2, true2, alpha=0.05)
    assert jnp.allclose(out2, ref2, atol=1e-5, rtol=1e-5), (out2, ref2)

    print("KERNEL_OK")
</pallas_src>

<mosaic_0001>
module attributes {stable_mosaic.version = 11 : i64} {
  func.func @_bce_blur_kernel(%arg0: i32, %arg1: memref<16x128xf32, #tpu.memory_space<vmem>>, %arg2: memref<16x128xf32, #tpu.memory_space<vmem>>, %arg3: memref<1x8x128xf32, #tpu.memory_space<vmem>>) attributes {dimension_semantics = [#tpu.dimension_semantics<parallel>], iteration_bounds = array<i64: 1>, scalar_prefetch = 0 : i64, scratch_operands = 0 : i64, tpu.core_type = #tpu.core_type<tc>, window_params = [{transform_indices = @transform_0, window_bounds = array<i64: 16, 128>}, {transform_indices = @transform_1, window_bounds = array<i64: 16, 128>}, {transform_indices = @transform_2, window_bounds = array<i64: 1, 8, 128>}]} {
    %c0 = arith.constant 0 : index
    %c0_0 = arith.constant 0 : index
    %0 = vector.load %arg1[%c0, %c0_0] : memref<16x128xf32, #tpu.memory_space<vmem>>, vector<16x128xf32>
    %c0_1 = arith.constant 0 : index
    %c0_2 = arith.constant 0 : index
    %1 = vector.load %arg2[%c0_1, %c0_2] : memref<16x128xf32, #tpu.memory_space<vmem>>, vector<16x128xf32>
    %2 = math.absf %0 : vector<16x128xf32>
    %cst = arith.constant 0.000000e+00 : f32
    %3 = vector.broadcast %cst : f32 to vector<16x128xf32>
    %4 = arith.subf %3, %2 : vector<16x128xf32>
    %5 = math.exp %4 : vector<16x128xf32>
    %cst_3 = arith.constant 0.000000e+00 : f32
    %6 = vector.broadcast %cst_3 : f32 to vector<16x128xf32>
    %7 = arith.maximumf %0, %6 : vector<16x128xf32>
    %8 = arith.mulf %0, %1 : vector<16x128xf32>
    %9 = arith.subf %7, %8 : vector<16x128xf32>
    %10 = math.log1p %5 : vector<16x128xf32>
    %11 = arith.addf %9, %10 : vector<16x128xf32>
    %cst_4 = arith.constant 1.000000e+00 : f32
    %12 = vector.broadcast %cst_4 : f32 to vector<16x128xf32>
    %13 = arith.addf %12, %5 : vector<16x128xf32>
    %cst_5 = arith.constant 1.000000e+00 : f32
    %14 = vector.broadcast %cst_5 : f32 to vector<16x128xf32>
    %15 = arith.divf %14, %13 : vector<16x128xf32>
    %cst_6 = arith.constant 0.000000e+00 : f32
    %16 = vector.broadcast %cst_6 : f32 to vector<16x128xf32>
    %17 = arith.cmpf oge, %0, %16 : vector<16x128xf32>
    %18 = arith.mulf %5, %15 : vector<16x128xf32>
    %19 = arith.select %17, %15, %18 : vector<16x128xi1>, vector<16x128xf32>
    %20 = arith.subf %19, %1 : vector<16x128xf32>
    %cst_7 = arith.constant 19.9600792 : f32
    %21 = vector.broadcast %cst_7 : f32 to vector<16x128xf32>
    %22 = arith.mulf %20, %21 : vector<16x128xf32>
    %23 = math.exp %22 : vector<16x128xf32>
    %cst_8 = arith.constant 2.14509965E-9 : f32
    %24 = vector.broadcast %cst_8 : f32 to vector<16x128xf32>
    %25 = arith.mulf %24, %23 : vector<16x128xf32>
    %cst_9 = arith.constant 1.000000e+00 : f32
    %26 = vector.broadcast %cst_9 : f32 to vector<16x128xf32>
    %27 = arith.subf %26, %25 : vector<16x128xf32>
    %28 = arith.mulf %11, %27 : vector<16x128xf32>
    %29 = vector.shape_cast %28 : vector<16x128xf32> to vector<2x8x128xf32>
    %cst_10 = arith.constant dense<0.000000e+00> : vector<8x128xf32>
    %30 = vector.multi_reduction <add>, %29, %cst_10 [0] : vector<2x8x128xf32> to vector<8x128xf32>
    %c0_11 = arith.constant 0 : index
    %c0_12 = arith.constant 0 : index
    %c0_13 = arith.constant 0 : index
    %31 = vector.load %arg3[%c0_11, %c0_12, %c0_13] : memref<1x8x128xf32, #tpu.memory_space<vmem>>, vector<1x8x128xf32>
    %32 = vector.shape_cast %31 : vector<1x8x128xf32> to vector<8x128xf32>
    %33 = vector.shape_cast %30 : vector<8x128xf32> to vector<1x8x128xf32>
    tpu.vector_store %arg3[%c0_11, %c0_12, %c0_13], %33 {strides = array<i32>} : memref<1x8x128xf32, #tpu.memory_space<vmem>>, vector<1x8x128xf32>,
    return
  }
  func.func @transform_0(%arg0: i32) -> (i32, i32) {
    %c0_i32 = arith.constant 0 : i32
    %c0_i32_0 = arith.constant 0 : i32
    return %arg0, %c0_i32 : i32, i32
  }
  func.func @transform_1(%arg0: i32) -> (i32, i32) {
    %c0_i32 = arith.constant 0 : i32
    %c0_i32_0 = arith.constant 0 : i32
    return %arg0, %c0_i32 : i32, i32
  }
  func.func @transform_2(%arg0: i32) -> (i32, i32, i32) {
    %c0_i32 = arith.constant 0 : i32
    %c0_i32_0 = arith.constant 0 : i32
    %c0_i32_1 = arith.constant 0 : i32
    return %arg0, %c0_i32, %c0_i32_0 : i32, i32, i32
  }
}

</mosaic_0001>

<bundles_post_ra>
// kernel: tpu_custom_call.1
= control target key start
LH: loop header
LB: loop body
LE: loop exit
PB: predicated region body
PF: predicated region fallthrough
CT: control target
= control target key end

     0   :  { %7 = vsyncpa [#allocation3], 0  ;;  %s308_s0 = inlined_call_operand.hbm [shape: f32[16,128], index: 0, kind: input, shape index: {}]   ;;  %s309_s1 = inlined_call_operand.hbm [shape: f32[16,128], index: 1, kind: input, shape index: {}]   ;;  %s310_s2 = inlined_call_operand.hbm [shape: f32[1,8,128], index: 2, kind: output, shape index: {}]  }
   0x1   :  { %8 = vsyncpa [#allocation6], 0 }
   0x2   :  { %9 = vsyncpa [#allocation4], 0  ;;  %s14_s11 = sshll.u32 %s308_s0, 4  ;;  %s253_s12 = smov [#allocation2]   ;;  %s15_s11 = int_to_ptr.hbm [resolvable:$true] %s14_s11 }
   0x3   :  { %s16_s13 = sshll.u32 %s253_s12, 4  ;;  %s27_s16 = sshll.u32 %s309_s1, 4  ;;  %s17_s13 = int_to_ptr.vmem [resolvable:$true] %s16_s13  ;;  %s28_s16 = int_to_ptr.hbm [resolvable:$true] %s27_s16 }
   0x4   :  { %s254_s17 = smov 128   ;;  %s255_s18 = smov 8  }
   0x5   :  { %22 = dma.hbm_to_vmem [thread:$0]  %s15_s11, 256, %s17_s13, [#allocation3], %s254_s17, %s254_s17, %s255_s18  }
   0x6   :  { %s256_s19 = smov [#allocation5]  }
   0x7   :  { %s29_s20 = sshll.u32 %s256_s19, 4  ;;  %s30_s20 = int_to_ptr.vmem [resolvable:$true] %s29_s20 }
   0x8   :  { %35 = dma.hbm_to_vmem [thread:$0]  %s28_s16, 256, %s30_s20, [#allocation6], %s254_s17, %s254_s17, %s255_s18  }
   0x9   :  { %247 = dma.done.wait [#allocation3], 256  }
   0xa   :  { %248 = vsyncadd [#allocation3], 4294967040 }
   0xb   :  { %249 = dma.done.wait [#allocation6], 256  }
   0xc   :  { %250 = vsyncadd [#allocation6], 4294967040  ;;  %v279_v0 = vld [vmem:[#allocation2] sm:$0xff]  ;;  %v281_v1 = vld [vmem:[#allocation2 + $0x8] sm:$0xff]  ;;  %s257_s0 = smov [#allocation7]   ;;  %s143_s23 = sshll.u32 %s310_s2, 4  ;;  %s144_s23 = int_to_ptr.hbm [resolvable:$true] %s143_s23 }
   0xd   :  { %v48_v2 = vand.u32 2147483647, %v279_v0  ;;  %v49_v3 = vand.u32 2147483647, %v281_v1  ;;  %vm114_vm8 = vcmp.ge.f32.partialorder %v279_v0, 0.0  ;;  %v46_v31 = vld [vmem:[#allocation5] sm:$0xff] }
   0xe   :  { %vm115_vm9 = vcmp.ge.f32.partialorder %v281_v1, 0.0  ;;  %v47_v34 = vld [vmem:[#allocation5 + $0x8] sm:$0xff]  ;;  %v56_v51 = vmax.f32 %v279_v0, 0.0  ;;  %v57_v52 = vmax.f32 %v281_v1, 0.0  ;;  %v58_v53 = vmul.f32 %v46_v31, %v279_v0  ;;  %s141_s1 = sshll.u32 %s257_s0, 4  ;;  %s142_s1 = int_to_ptr.vmem [resolvable:$true] %s141_s1 }
   0xf   :  { %v50_v4 = vsub.f32 0.0, %v48_v2  ;;  %v51_v5 = vsub.f32 0.0, %v49_v3  ;;  %v59_v55 = vmul.f32 %v47_v34, %v281_v1 }
  0x10   :  { %v60_v60 = vsub.f32 %v56_v51, %v58_v53 }
  0x11   :  { %v52_v6 = vmul.f32 1.442695, %v50_v4  ;;  %v54_v7 = vmul.f32 1.442695, %v51_v5  ;;  %v61_v61 = vsub.f32 %v57_v52, %v59_v55 }
  0x13   :  { %159 = vpow2.f32 %v52_v6 }
  0x14   :  { %161 = vpow2.f32 %v54_v7 }
  0x19   :  { %v285_v8 = vpop.eup %159 }
  0x1a   :  { %v287_v9 = vpop.eup %161  ;;  %v62_v10 = vadd.f32 1.0, %v285_v8  ;;  %v65_v35 = vmul.f32 -0.5, %v285_v8  ;;  %v68_v45 = vand.u32 2147483647, %v285_v8 }
  0x1b   :  { %v71_v11 = vadd.f32 1.0, %v287_v9  ;;  %v74_v37 = vmul.f32 -0.5, %v287_v9  ;;  %v77_v49 = vand.u32 2147483647, %v287_v9 }
  0x1c   :  { %163 = vrcp.f32 %v62_v10  ;;  %vm89_vm0 = vweird.f32 %v62_v10  ;;  %v95_v15 = vand.u32 2147483648, %v62_v10  ;;  %v93_v18 = vand.u32 2147483647, %v62_v10 }
  0x1d   :  { %165 = vrcp.f32 %v71_v11  ;;  %v110_v19 = vand.u32 2147483648, %v71_v11  ;;  %vm104_vm2 = vweird.f32 %v71_v11  ;;  %v108_v21 = vand.u32 2147483647, %v71_v11 }
  0x1e   :  { %v96_v23 = vor.u32 1.1754944e-38, %v95_v15  ;;  %vm94_vm5 = vcmp.eq.f32.partialorder %v93_v18, 8.507059e+37  ;;  %167 = vlog2.f32 %v62_v10  ;;  %v66_v42 = vadd.f32 1.0, %v65_v35 }
  0x1f   :  { %v111_v26 = vor.u32 1.1754944e-38, %v110_v19  ;;  %vm109_vm7 = vcmp.eq.f32.partialorder %v108_v21, 8.507059e+37  ;;  %169 = vlog2.f32 %v71_v11  ;;  %v75_v46 = vadd.f32 1.0, %v74_v37 }
  0x20   :  { %v67_v57 = vmul.f32 %v285_v8, %v66_v42  ;;  %vm69_vm10 = vcmp.lt.f32.partialorder %v68_v45, 0.0004427343  ;;  %vm78_vm11 = vcmp.lt.f32.partialorder %v77_v49, 0.0004427343 }
  0x21   :  { %v76_v59 = vmul.f32 %v287_v9, %v75_v46 }
  0x22   :  { %v164_v12 = vpop.eup %163 }
  0x23   :  { %v166_v13 = vpop.eup %165  ;;  %v85_v14 = vmul.f32 %v164_v12, %v62_v10  ;;  %vm90_vm1 = vweird.f32 %v164_v12 }
  0x24   :  { %v100_v16 = vmul.f32 %v166_v13, %v71_v11  ;;  %vm105_vm3 = vweird.f32 %v166_v13  ;;  %vm91_vm4 = vmor %vm89_vm0, %vm90_vm1  ;;  %v168_v44 = vpop.eup %167 }
  0x25   :  { %v86_v17 = vsub.f32 1.0, %v85_v14  ;;  %vm106_vm6 = vmor %vm104_vm2, %vm105_vm3  ;;  %v170_v48 = vpop.eup %169  ;;  %v64_v56 = vmul.f32 0.6931472, %v168_v44 }
  0x26   :  { %v101_v20 = vsub.f32 1.0, %v100_v16  ;;  %v73_v58 = vmul.f32 0.6931472, %v170_v48 }
  0x27   :  { %v87_v22 = vmul.f32 %v164_v12, %v86_v17  ;;  %v70_v62 = vsel %vm69_vm10, %v67_v57, %v64_v56 }
  0x28   :  { %v102_v24 = vmul.f32 %v166_v13, %v101_v20  ;;  %v79_v63 = vsel %vm78_vm11, %v76_v59, %v73_v58  ;;  %v80_v0 = vadd.f32 %v70_v62, %v60_v60 }
  0x29   :  { %v88_v25 = vadd.f32 %v164_v12, %v87_v22  ;;  %v81_v5 = vadd.f32 %v79_v63, %v61_v61 }
  0x2a   :  { %v103_v27 = vadd.f32 %v166_v13, %v102_v24 }
  0x2b   :  { %v92_v28 = vsel %vm91_vm4, %v164_v12, %v88_v25 }
  0x2c   :  { %v97_v29 = vsel %vm94_vm5, %v96_v23, %v92_v28  ;;  %v107_v30 = vsel %vm106_vm6, %v166_v13, %v103_v27 }
  0x2d   :  { %v112_v32 = vsel %vm109_vm7, %v111_v26, %v107_v30  ;;  %v116_v33 = vmul.f32 %v285_v8, %v97_v29 }
  0x2e   :  { %v117_v36 = vmul.f32 %v287_v9, %v112_v32 }
  0x2f   :  { %v118_v38 = vsel %vm114_vm8, %v97_v29, %v116_v33 }
  0x30   :  { %v119_v39 = vsel %vm115_vm9, %v112_v32, %v117_v36  ;;  %v120_v40 = vsub.f32 %v118_v38, %v46_v31 }
  0x31   :  { %v121_v41 = vsub.f32 %v119_v39, %v47_v34 }
  0x32   :  { %v122_v43 = vmul.f32 19.96008, %v120_v40 }
  0x33   :  { %v123_v47 = vmul.f32 19.96008, %v121_v41 }
  0x34   :  { %v124_v50 = vmul.f32 1.442695, %v122_v43 }
  0x35   :  { %v126_v54 = vmul.f32 1.442695, %v123_v47 }
  0x36   :  { %171 = vpow2.f32 %v124_v50 }
  0x37   :  { %173 = vpow2.f32 %v126_v54 }
  0x3c   :  { %v172_v2 = vpop.eup %171 }
  0x3d   :  { %v174_v3 = vpop.eup %173  ;;  %v128_v4 = vmul.f32 2.1450997e-09, %v172_v2 }
  0x3e   :  { %v129_v1 = vmul.f32 2.1450997e-09, %v174_v3 }
  0x3f   :  { %v130_v6 = vsub.f32 1.0, %v128_v4 }
  0x40   :  { %v131_v7 = vsub.f32 1.0, %v129_v1 }
  0x41   :  { %v132_v8 = vmul.f32 %v130_v6, %v80_v0 }
  0x42   :  { %v133_v9 = vmul.f32 %v131_v7, %v81_v5 }
  0x44   :  { %v134_v10 = vadd.f32 %v133_v9, %v132_v8 }
  0x46   :  { %135 = vst [vmem:[#allocation7] sm:$0xff] %v134_v10 }
  0x47   :  { %146 = dma.vmem_to_hbm [thread:$0]  %s142_s1, 128, %s144_s23, [#allocation4]  }
  0x48   :  { %251 = dma.done.wait [#allocation4], 128  }
  0x49   :  { %252 = vsyncadd [#allocation4], 4294967168 }
  0x4a   :  { %151 = vsyncpa [#allocation3], 1 }
  0x4b   :  { %152 = vsyncpa [#allocation6], 1 }
  0x4c   :  { %153 = vsyncpa [#allocation4], 1 }

</bundles_post_ra>
